<compile_context>
chip_gen: v5e
topology: v5e:2x2
jax: 0.10.0
libtpu: 0.0.40
codegen_flags: <defaults>
</compile_context>

<pallas_src>
import jax
import jax.numpy as jnp
from jax.experimental import pallas as pl
from jax.experimental.pallas import tpu as pltpu

LANE_W = 1024             # 8 sublanes * 128 lanes: lane-dense last dim
TARGET_BLOCK_ROWS = 1024  # 1024 x 1024 x 4 B = 4 MiB per f32 block
SMALL_N = 1 << 16         # below this, fused XLA beats custom-call overhead


def _str_kernel(f_ref, ind_ref, o_ref):
    f = f_ref[...]
    # Sigmoid in f32 on the EUP: exp + approx reciprocal (no VALU divide chain).
    x = ind_ref[...].astype(jnp.float32)
    sig = pl.reciprocal(1.0 + jnp.exp(-x), approx=True).astype(f.dtype)
    # relu(|f| - sigmoid) in the input dtype (bf16 stays packed on v6e/v7x).
    shrunk = jnp.maximum(jnp.abs(f) - sig, 0.0)
    # sign(f) * shrunk  ==  where(f >= 0, shrunk, -shrunk)
    # (the f == 0 case already yields shrunk == 0, so the select is exact).
    o_ref[...] = jnp.where(f >= 0, shrunk, -shrunk).astype(o_ref.dtype)


def _choose_block_rows(rows: int) -> int:
    """Pick a row-block: full extent for tiny inputs, otherwise a multiple of 8
    that gives >= 2 grid steps (both TCs on v7x) and <= TARGET_BLOCK_ROWS."""
    if rows <= 8:
        return rows
    half = -(-rows // 2)          # cdiv(rows, 2) -> at least a 2-step grid
    half = -(-half // 8) * 8      # round up to a sublane multiple
    return min(TARGET_BLOCK_ROWS, half)


def _str_main(f2: jnp.ndarray, i2: jnp.ndarray) -> jnp.ndarray:
    """Run the streaming kernel on an aligned [rows, LANE_W] slab (no copies)."""
    rows, width = f2.shape
    dtype = f2.dtype
    block_rows = _choose_block_rows(rows)
    grid = (pl.cdiv(rows, block_rows),)

    n = rows * width
    bytes_per = (2 * jnp.dtype(dtype).itemsize + jnp.dtype(i2.dtype).itemsize)
    cost = pl.CostEstimate(
        flops=7 * n,               # neg, add, abs, sub, max, cmp/select, neg
        transcendentals=2 * n,     # exp + reciprocal
        bytes_accessed=bytes_per * n,
    )

    return pl.pallas_call(
        _str_kernel,
        out_shape=jax.ShapeDtypeStruct((rows, width), dtype),
        grid_spec=pltpu.PrefetchScalarGridSpec(
            num_scalar_prefetch=0,
            grid=grid,
            in_specs=[
                pl.BlockSpec((block_rows, width), lambda i: (i, 0)),
                pl.BlockSpec((block_rows, width), lambda i: (i, 0)),
            ],
            out_specs=pl.BlockSpec((block_rows, width), lambda i: (i, 0)),
        ),
        compiler_params=pltpu.CompilerParams(
            dimension_semantics=("parallel",),   # shards across both TCs on v7x
            vmem_limit_bytes=32 << 20,           # 24 MiB used; fits every gen
        ),
        cost_estimate=cost,
    )(f2, i2)


def _str_jax(feature: jnp.ndarray, indicator: jnp.ndarray) -> jnp.ndarray:
    """Pure fused-XLA path: optimal for tiny or 1024-unaligned tensors."""
    f = feature.astype(jnp.float32)
    ind = jax.nn.sigmoid(indicator.astype(jnp.float32))
    out = jnp.sign(f) * jnp.maximum(jnp.abs(f) - ind, 0.0)
    return out.astype(feature.dtype)


def str_transform(feature: jnp.ndarray, indicator: jnp.ndarray,
                  *, min_kernel_elems: int = SMALL_N) -> jnp.ndarray:
    """STRTransform.forward: sign(f) * relu(|f| - sigmoid(indicator))."""
    assert feature.shape == indicator.shape, "module applies elementwise on equal shapes"
    orig_shape = feature.shape
    dtype = feature.dtype
    n = int(feature.size)

    if n == 0:                                   # zero-size: nothing to do
        return jnp.zeros(orig_shape, dtype)

    # Small tensors (launch overhead dominates) and lengths that are not a
    # multiple of LANE_W (any slice/pad/concat around the custom call would
    # cost 2-3x the ideal HBM traffic) use the fused-XLA path directly.
    if n < min_kernel_elems or (n % LANE_W) != 0:
        return _str_jax(feature, indicator)

    rows = n // LANE_W
    f2 = feature.reshape(rows, LANE_W)           # contiguous -> free reshape
    i2 = indicator.reshape(rows, LANE_W)
    return _str_main(f2, i2).reshape(orig_shape)


def str_transform_ref(feature, indicator):
    ind = jax.nn.sigmoid(indicator.astype(jnp.float32))
    f = feature.astype(jnp.float32)
    out = jnp.sign(f) * jnp.maximum(jnp.abs(f) - ind, 0.0)
    return out.astype(feature.dtype)


if __name__ == "__main__":
    key = jax.random.PRNGKey(0)
    keys = jax.random.split(key, 8)

    # 1) Small NCHW shape consistent with the module, default dispatch
    #    (goes through the fused-XLA fast path).
    f1 = jax.random.normal(keys[0], (2, 4, 16, 16), dtype=jnp.float32)
    i1 = jax.random.normal(keys[1], (2, 4, 16, 16), dtype=jnp.float32)
    o1 = jax.block_until_ready(str_transform(f1, i1))
    assert o1.shape == f1.shape
    assert jnp.allclose(o1, str_transform_ref(f1, i1), atol=1e-5, rtol=1e-5)

    # 2) Same small shape, forced through the Pallas kernel (n % 1024 == 0).
    o2 = jax.block_until_ready(str_transform(f1, i1, min_kernel_elems=0))
    assert jnp.allclose(o2, str_transform_ref(f1, i1), atol=5e-3, rtol=5e-3)

    # 3) Kernel path with a >=2-step parallel grid and a ragged last row-block
    #    (rows = 40, block_rows = 24): exercises Pallas row masking.
    f3 = jax.random.normal(keys[2], (4, 8, 32, 40), dtype=jnp.float32)
    i3 = jax.random.normal(keys[3], (4, 8, 32, 40), dtype=jnp.float32)
    o3 = jax.block_until_ready(str_transform(f3, i3, min_kernel_elems=0))
    assert o3.shape == f3.shape
    assert jnp.allclose(o3, str_transform_ref(f3, i3), atol=5e-3, rtol=5e-3)

    # 4) 1024-unaligned shape: dispatches to the fused-XLA path (no copies).
    f4 = jax.random.normal(keys[4], (1, 5, 17, 13), dtype=jnp.float32)
    i4 = jax.random.normal(keys[5], (1, 5, 17, 13), dtype=jnp.float32)
    o4 = jax.block_until_ready(str_transform(f4, i4))
    assert o4.shape == f4.shape
    assert jnp.allclose(o4, str_transform_ref(f4, i4), atol=1e-5, rtol=1e-5)

    # 5) bf16 inputs through the kernel (bf16 VALU math, f32 sigmoid).
    f5 = jax.random.normal(keys[6], (2, 4, 16, 16), dtype=jnp.bfloat16)
    i5 = jax.random.normal(keys[7], (2, 4, 16, 16), dtype=jnp.bfloat16)
    o5 = jax.block_until_ready(str_transform(f5, i5, min_kernel_elems=0))
    assert o5.dtype == jnp.bfloat16
    assert jnp.allclose(o5.astype(jnp.float32),
                        str_transform_ref(f5, i5).astype(jnp.float32),
                        atol=2e-2, rtol=2e-2)

    print("KERNEL_OK")
</pallas_src>

<mosaic_0001>
module attributes {stable_mosaic.version = 11 : i64} {
  func.func @_str_kernel(%arg0: i32, %arg1: memref<2x1024xf32, #tpu.memory_space<vmem>>, %arg2: memref<2x1024xf32, #tpu.memory_space<vmem>>, %arg3: memref<2x1024xf32, #tpu.memory_space<vmem>>) attributes {dimension_semantics = [#tpu.dimension_semantics<parallel>], iteration_bounds = array<i64: 1>, scalar_prefetch = 0 : i64, scratch_operands = 0 : i64, tpu.core_type = #tpu.core_type<tc>, window_params = [{transform_indices = @transform_0, window_bounds = array<i64: 2, 1024>}, {transform_indices = @transform_1, window_bounds = array<i64: 2, 1024>}, {transform_indices = @transform_2, window_bounds = array<i64: 2, 1024>}]} {
    %c0 = arith.constant 0 : index
    %c0_0 = arith.constant 0 : index
    %0 = vector.load %arg1[%c0, %c0_0] : memref<2x1024xf32, #tpu.memory_space<vmem>>, vector<2x1024xf32>
    %c0_1 = arith.constant 0 : index
    %c0_2 = arith.constant 0 : index
    %1 = vector.load %arg2[%c0_1, %c0_2] : memref<2x1024xf32, #tpu.memory_space<vmem>>, vector<2x1024xf32>
    %cst = arith.constant 0.000000e+00 : f32
    %2 = vector.broadcast %cst : f32 to vector<2x1024xf32>
    %3 = arith.subf %2, %1 : vector<2x1024xf32>
    %4 = math.exp %3 : vector<2x1024xf32>
    %cst_3 = arith.constant 1.000000e+00 : f32
    %5 = vector.broadcast %cst_3 : f32 to vector<2x1024xf32>
    %6 = arith.addf %5, %4 : vector<2x1024xf32>
    %7 = tpu.reciprocal %6 {approx = true} : vector<2x1024xf32> -> vector<2x1024xf32>
    %8 = math.absf %0 : vector<2x1024xf32>
    %9 = arith.subf %8, %7 : vector<2x1024xf32>
    %cst_4 = arith.constant 0.000000e+00 : f32
    %10 = vector.broadcast %cst_4 : f32 to vector<2x1024xf32>
    %11 = arith.maximumf %9, %10 : vector<2x1024xf32>
    %cst_5 = arith.constant 0.000000e+00 : f32
    %12 = vector.broadcast %cst_5 : f32 to vector<2x1024xf32>
    %13 = arith.cmpf oge, %0, %12 : vector<2x1024xf32>
    %cst_6 = arith.constant 0.000000e+00 : f32
    %14 = vector.broadcast %cst_6 : f32 to vector<2x1024xf32>
    %15 = arith.subf %14, %11 : vector<2x1024xf32>
    %16 = arith.select %13, %11, %15 : vector<2x1024xi1>, vector<2x1024xf32>
    %c0_7 = arith.constant 0 : index
    %c0_8 = arith.constant 0 : index
    %17 = vector.load %arg3[%c0_7, %c0_8] : memref<2x1024xf32, #tpu.memory_space<vmem>>, vector<2x1024xf32>
    tpu.vector_store %arg3[%c0_7, %c0_8], %16 {strides = array<i32>} : memref<2x1024xf32, #tpu.memory_space<vmem>>, vector<2x1024xf32>,
    return
  }
  func.func @transform_0(%arg0: i32) -> (i32, i32) {
    %c0_i32 = arith.constant 0 : i32
    %c0_i32_0 = arith.constant 0 : i32
    return %arg0, %c0_i32 : i32, i32
  }
  func.func @transform_1(%arg0: i32) -> (i32, i32) {
    %c0_i32 = arith.constant 0 : i32
    %c0_i32_0 = arith.constant 0 : i32
    return %arg0, %c0_i32 : i32, i32
  }
  func.func @transform_2(%arg0: i32) -> (i32, i32) {
    %c0_i32 = arith.constant 0 : i32
    %c0_i32_0 = arith.constant 0 : i32
    return %arg0, %c0_i32 : i32, i32
  }
}

</mosaic_0001>

<bundles_post_ra>
// kernel: tpu_custom_call.1
= control target key start
LH: loop header
LB: loop body
LE: loop exit
PB: predicated region body
PF: predicated region fallthrough
CT: control target
= control target key end

     0   :  { %7 = vsyncpa [#allocation3], 0  ;;  %s202_s0 = inlined_call_operand.hbm [shape: f32[2,1024], index: 0, kind: input, shape index: {}]   ;;  %s203_s1 = inlined_call_operand.hbm [shape: f32[2,1024], index: 1, kind: input, shape index: {}]   ;;  %s204_s2 = inlined_call_operand.hbm [shape: f32[2,1024], index: 2, kind: output, shape index: {}]  }
   0x1   :  { %8 = vsyncpa [#allocation6], 0 }
   0x2   :  { %9 = vsyncpa [#allocation4], 0  ;;  %s15_s11 = sshll.u32 %s202_s0, 4  ;;  %s175_s12 = smov [#allocation2]   ;;  %s16_s11 = int_to_ptr.hbm [resolvable:$true] %s15_s11 }
   0x3   :  { %s17_s13 = sshll.u32 %s175_s12, 4  ;;  %s26_s16 = sshll.u32 %s203_s1, 4  ;;  %s18_s13 = int_to_ptr.vmem [resolvable:$true] %s17_s13  ;;  %s27_s16 = int_to_ptr.hbm [resolvable:$true] %s26_s16 }
   0x4   :  { %20 = dma.hbm_to_vmem [thread:$0]  %s16_s11, 256, %s18_s13, [#allocation3]  }
   0x5   :  { %s176_s17 = smov [#allocation5]  }
   0x6   :  { %s28_s18 = sshll.u32 %s176_s17, 4  ;;  %s29_s18 = int_to_ptr.vmem [resolvable:$true] %s28_s18 }
   0x7   :  { %31 = dma.hbm_to_vmem [thread:$0]  %s27_s16, 256, %s29_s18, [#allocation6]  }
   0x8   :  { %169 = dma.done.wait [#allocation3], 256  }
   0x9   :  { %170 = vsyncadd [#allocation3], 4294967040 }
   0xa   :  { %171 = dma.done.wait [#allocation6], 256  }
   0xb   :  { %172 = vsyncadd [#allocation6], 4294967040  ;;  %v42_v0 = vld [vmem:[#allocation5] sm:$0xff]  ;;  %v43_v2 = vld [vmem:[#allocation5 + $0x8] sm:$0xff]  ;;  %s177_s0 = smov [#allocation7]   ;;  %s75_s21 = sshll.u32 %s204_s2, 4  ;;  %s76_s21 = int_to_ptr.hbm [resolvable:$true] %s75_s21 }
   0xc   :  { %v44_v1 = vsub.f32 0.0, %v42_v0  ;;  %v45_v3 = vsub.f32 0.0, %v43_v2  ;;  %v40_v10 = vld [vmem:[#allocation2] sm:$0xff]  ;;  %v41_v11 = vld [vmem:[#allocation2 + $0x8] sm:$0xff]  ;;  %s73_s1 = sshll.u32 %s177_s0, 4  ;;  %s74_s1 = int_to_ptr.vmem [resolvable:$true] %s73_s1 }
   0xd   :  { %v54_v12 = vand.u32 2147483647, %v40_v10  ;;  %v55_v13 = vand.u32 2147483647, %v41_v11  ;;  %vm60_vm0 = vcmp.ge.f32.partialorder %v40_v10, 0.0  ;;  %vm61_vm1 = vcmp.ge.f32.partialorder %v41_v11, 0.0 }
   0xe   :  { %v46_v4 = vmul.f32 1.442695, %v44_v1  ;;  %v48_v5 = vmul.f32 1.442695, %v45_v3 }
  0x10   :  { %89 = vpow2.f32 %v46_v4 }
  0x11   :  { %91 = vpow2.f32 %v48_v5 }
  0x16   :  { %v90_v6 = vpop.eup %89 }
  0x17   :  { %v92_v7 = vpop.eup %91  ;;  %v50_v8 = vadd.f32 1.0, %v90_v6 }
  0x18   :  { %v51_v9 = vadd.f32 1.0, %v92_v7 }
  0x19   :  { %93 = vrcp.f32 %v50_v8 }
  0x1a   :  { %95 = vrcp.f32 %v51_v9 }
  0x1f   :  { %v94_v14 = vpop.eup %93 }
  0x20   :  { %v96_v15 = vpop.eup %95  ;;  %v56_v16 = vsub.f32 %v54_v12, %v94_v14 }
  0x21   :  { %v57_v17 = vsub.f32 %v55_v13, %v96_v15 }
  0x22   :  { %v58_v18 = vmax.f32 %v56_v16, 0.0 }
  0x23   :  { %v59_v19 = vmax.f32 %v57_v17, 0.0 }
  0x24   :  { %v62_v20 = vsub.f32 0.0, %v58_v18 }
  0x25   :  { %v63_v21 = vsub.f32 0.0, %v59_v19 }
  0x26   :  { %v64_v22 = vsel %vm60_vm0, %v58_v18, %v62_v20 }
  0x27   :  { %66 = vst [vmem:[#allocation7] sm:$0xff] %v64_v22  ;;  %v65_v23 = vsel %vm61_vm1, %v59_v19, %v63_v21 }
  0x28   :  { %67 = vst [vmem:[#allocation7 + $0x8] sm:$0xff] %v65_v23 }
  0x29   :  { %78 = dma.vmem_to_hbm [thread:$0]  %s74_s1, 256, %s76_s21, [#allocation4]  }
  0x2a   :  { %173 = dma.done.wait [#allocation4], 256  }
  0x2b   :  { %174 = vsyncadd [#allocation4], 4294967040 }
  0x2c   :  { %83 = vsyncpa [#allocation3], 1 }
  0x2d   :  { %84 = vsyncpa [#allocation6], 1 }
  0x2e   :  { %85 = vsyncpa [#allocation4], 1 }

</bundles_post_ra>
